<compile_context>
chip_gen: v7x
topology: tpu7x:2x2x1
jax: 0.10.0
libtpu: 0.0.40
codegen_flags: <defaults>
</compile_context>

<pallas_src>
import functools

import jax
import jax.numpy as jnp
from jax.experimental import pallas as pl
from jax.experimental.pallas import tpu as pltpu

NEG_SLOPE = 0.01   # PyTorch LeakyReLU default negative_slope
HIDDEN = 256


def _round_up(x, m):
    return ((x + m - 1) // m) * m


def _leaky_relu(v):
    return jnp.where(v > 0, v, NEG_SLOPE * v)


def q_mlp_kernel(x_ref, w1_ref, b1_ref, w2_ref, b2_ref, w3_ref, b3_ref, o_ref):
    # x tile: (TB, K_pad) bf16. Weights are bf16, biases f32.
    # All three matmuls run on the MXU with f32 accumulation; activations in f32.
    x = x_ref[...]

    h = jnp.dot(x, w1_ref[...], preferred_element_type=jnp.float32) + b1_ref[...]
    h = _leaky_relu(h)

    h = jnp.dot(h.astype(jnp.bfloat16), w2_ref[...],
                preferred_element_type=jnp.float32) + b2_ref[...]
    h = _leaky_relu(h)

    h = jnp.dot(h.astype(jnp.bfloat16), w3_ref[...],
                preferred_element_type=jnp.float32) + b3_ref[...]
    h = _leaky_relu(h)

    o_ref[...] = h.astype(o_ref.dtype)


@functools.partial(jax.jit, static_argnames=("block_b",))
def q_forward(x, params, *, block_b=256):
    """x: (B, state_dim) float32. params: dict with transposed weights (in, out)."""
    w1, b1 = params["w1"], params["b1"]   # (state_dim, 256), (1, 256)
    w2, b2 = params["w2"], params["b2"]   # (256, 256),       (1, 256)
    w3, b3 = params["w3"], params["b3"]   # (256, action_dim),(1, action_dim)

    B, state_dim = x.shape
    action_dim = w3.shape[1]
    H = w1.shape[1]

    # Lane-friendly padding of the contraction (layer 1) and output widths.
    k_pad = _round_up(max(state_dim, 128), 128)
    n_pad = _round_up(max(action_dim, 128), 128)

    # Batch tile: large blocks for pipelining; tiny batches stay single-tile.
    tb = block_b if B >= block_b else _round_up(max(B, 8), 8)
    b_pad = _round_up(B, tb)
    n_tiles = b_pad // tb

    # Pad + cast once in the wrapper (halves x/weight DMA bytes).
    x_p = jnp.zeros((b_pad, k_pad), jnp.bfloat16)
    x_p = x_p.at[:B, :state_dim].set(x.astype(jnp.bfloat16))

    w1_p = jnp.zeros((k_pad, H), jnp.bfloat16).at[:state_dim, :].set(
        w1.astype(jnp.bfloat16))
    w2_b = w2.astype(jnp.bfloat16)
    w3_p = jnp.zeros((H, n_pad), jnp.bfloat16).at[:, :action_dim].set(
        w3.astype(jnp.bfloat16))

    b1_f = b1.astype(jnp.float32)
    b2_f = b2.astype(jnp.float32)
    b3_p = jnp.zeros((1, n_pad), jnp.float32).at[:, :action_dim].set(
        b3.astype(jnp.float32))

    resident = lambda shape: pl.BlockSpec(shape, lambda i: (0, 0))

    flops = 2 * b_pad * (k_pad * H + H * H + H * n_pad)
    bytes_accessed = (x_p.size * 2 + w1_p.size * 2 + w2_b.size * 2 + w3_p.size * 2
                      + (b1_f.size + b2_f.size + b3_p.size) * 4
                      + b_pad * n_pad * 4)

    out_padded = pl.pallas_call(
        q_mlp_kernel,
        out_shape=jax.ShapeDtypeStruct((b_pad, n_pad), jnp.float32),
        grid=(n_tiles,),
        in_specs=[
            pl.BlockSpec((tb, k_pad), lambda i: (i, 0)),   # x: tiled over batch
            resident((k_pad, H)), resident((1, H)),        # w1, b1 (VMEM-resident)
            resident((H, H)),     resident((1, H)),        # w2, b2
            resident((H, n_pad)), resident((1, n_pad)),    # w3, b3
        ],
        out_specs=pl.BlockSpec((tb, n_pad), lambda i: (i, 0)),
        compiler_params=pltpu.CompilerParams(
            dimension_semantics=("parallel",),             # 2-TC sharding on v7x
            vmem_limit_bytes=32 << 20,
        ),
        cost_estimate=pl.CostEstimate(
            flops=int(flops), transcendentals=0, bytes_accessed=int(bytes_accessed)),
    )(x_p, w1_p, b1_f, w2_b, b2_f, w3_p, b3_p)

    return out_padded[:B, :action_dim]


def init_params(key, state_dim, action_dim, hidden=HIDDEN):
    """Deterministic synthetic init (shapes match nn.Linear; transposed (in,out) layout)."""
    ks = jax.random.split(key, 6)

    def lin(kw, kb, fan_in, fan_out):
        scale = 1.0 / jnp.sqrt(jnp.float32(fan_in))
        w = jax.random.normal(kw, (fan_in, fan_out), jnp.float32) * scale
        b = jax.random.normal(kb, (1, fan_out), jnp.float32) * scale
        return w, b

    w1, b1 = lin(ks[0], ks[1], state_dim, hidden)
    w2, b2 = lin(ks[2], ks[3], hidden, hidden)
    w3, b3 = lin(ks[4], ks[5], hidden, action_dim)
    return {"w1": w1, "b1": b1, "w2": w2, "b2": b2, "w3": w3, "b3": b3}


def q_reference(x, p):
    """Pure-JAX reference matching the PyTorch forward, mirroring the kernel's
    bf16 matmul-operand quantization (f32 accumulate, f32 bias + activation)."""
    bf = lambda a: a.astype(jnp.bfloat16).astype(jnp.float32)
    h = jax.nn.leaky_relu(bf(x) @ bf(p["w1"]) + p["b1"], NEG_SLOPE)
    h = jax.nn.leaky_relu(bf(h) @ bf(p["w2"]) + p["b2"], NEG_SLOPE)
    return jax.nn.leaky_relu(bf(h) @ bf(p["w3"]) + p["b3"], NEG_SLOPE)


if __name__ == "__main__":
    state_dim, action_dim = 32, 8

    key = jax.random.PRNGKey(0)
    k_x, k_p, k_x2 = jax.random.split(key, 3)
    params = init_params(k_p, state_dim, action_dim)

    # Small, module-consistent shape: single tile, grid=(1,).
    x_small = jax.random.normal(k_x, (8, state_dim), jnp.float32)
    out_small = jax.block_until_ready(q_forward(x_small, params))
    assert out_small.shape == (8, action_dim)
    assert jnp.allclose(out_small, q_reference(x_small, params),
                        atol=1e-3, rtol=1e-3), "small-batch mismatch vs reference"

    # Larger batch: exercises the batch grid, pipelining, and ragged padding.
    x_big = jax.random.normal(k_x2, (300, state_dim), jnp.float32)
    out_big = jax.block_until_ready(q_forward(x_big, params))
    assert out_big.shape == (300, action_dim)
    assert jnp.allclose(out_big, q_reference(x_big, params),
                        atol=1e-3, rtol=1e-3), "batched mismatch vs reference"

    print("KERNEL_OK")
</pallas_src>

<mosaic_0001>
module attributes {stable_mosaic.version = 11 : i64} {
  func.func @q_mlp_kernel(%arg0: i32, %arg1: memref<8x128xbf16, #tpu.memory_space<vmem>>, %arg2: memref<128x256xbf16, #tpu.memory_space<vmem>>, %arg3: memref<1x256xf32, #tpu.memory_space<vmem>>, %arg4: memref<256x256xbf16, #tpu.memory_space<vmem>>, %arg5: memref<1x256xf32, #tpu.memory_space<vmem>>, %arg6: memref<256x128xbf16, #tpu.memory_space<vmem>>, %arg7: memref<1x128xf32, #tpu.memory_space<vmem>>, %arg8: memref<8x128xf32, #tpu.memory_space<vmem>>) attributes {dimension_semantics = [#tpu.dimension_semantics<parallel>], iteration_bounds = array<i64: 1>, scalar_prefetch = 0 : i64, scratch_operands = 0 : i64, tpu.core_type = #tpu.core_type<tc>, window_params = [{transform_indices = @transform_0, window_bounds = array<i64: 8, 128>}, {pipeline_mode = #tpu.pipeline_mode<synchronous>, transform_indices = @transform_1, window_bounds = array<i64: 128, 256>}, {pipeline_mode = #tpu.pipeline_mode<synchronous>, transform_indices = @transform_2, window_bounds = array<i64: 1, 256>}, {pipeline_mode = #tpu.pipeline_mode<synchronous>, transform_indices = @transform_3, window_bounds = array<i64: 256, 256>}, {pipeline_mode = #tpu.pipeline_mode<synchronous>, transform_indices = @transform_4, window_bounds = array<i64: 1, 256>}, {pipeline_mode = #tpu.pipeline_mode<synchronous>, transform_indices = @transform_5, window_bounds = array<i64: 256, 128>}, {pipeline_mode = #tpu.pipeline_mode<synchronous>, transform_indices = @transform_6, window_bounds = array<i64: 1, 128>}, {transform_indices = @transform_7, window_bounds = array<i64: 8, 128>}]} {
    %c0 = arith.constant 0 : index
    %c0_0 = arith.constant 0 : index
    %0 = vector.load %arg1[%c0, %c0_0] : memref<8x128xbf16, #tpu.memory_space<vmem>>, vector<8x128xbf16>
    %c0_1 = arith.constant 0 : index
    %c0_2 = arith.constant 0 : index
    %1 = vector.load %arg2[%c0_1, %c0_2] : memref<128x256xbf16, #tpu.memory_space<vmem>>, vector<128x256xbf16>
    %cst = arith.constant dense<0.000000e+00> : vector<8x256xf32>
    %2 = tpu.matmul %0, %1, %cst {dimension_numbers = #tpu.dot_dimension_numbers<[1], [0], [0], [1], [0, 0, 1, 1], [], []>} : vector<8x128xbf16>, vector<128x256xbf16>, vector<8x256xf32> -> vector<8x256xf32>
    %c0_3 = arith.constant 0 : index
    %c0_4 = arith.constant 0 : index
    %3 = vector.load %arg3[%c0_3, %c0_4] : memref<1x256xf32, #tpu.memory_space<vmem>>, vector<1x256xf32>
    %4 = vector.broadcast %3 : vector<1x256xf32> to vector<8x256xf32>
    %5 = arith.addf %2, %4 : vector<8x256xf32>
    %cst_5 = arith.constant 0.000000e+00 : f32
    %6 = vector.broadcast %cst_5 : f32 to vector<8x256xf32>
    %7 = arith.cmpf ogt, %5, %6 : vector<8x256xf32>
    %cst_6 = arith.constant 0.00999999977 : f32
    %8 = vector.broadcast %cst_6 : f32 to vector<8x256xf32>
    %9 = arith.mulf %8, %5 : vector<8x256xf32>
    %10 = arith.select %7, %5, %9 : vector<8x256xi1>, vector<8x256xf32>
    %11 = arith.truncf %10 : vector<8x256xf32> to vector<8x256xbf16>
    %c0_7 = arith.constant 0 : index
    %c0_8 = arith.constant 0 : index
    %12 = vector.load %arg4[%c0_7, %c0_8] : memref<256x256xbf16, #tpu.memory_space<vmem>>, vector<256x256xbf16>
    %cst_9 = arith.constant dense<0.000000e+00> : vector<8x256xf32>
    %13 = tpu.matmul %11, %12, %cst_9 {dimension_numbers = #tpu.dot_dimension_numbers<[1], [0], [0], [1], [0, 0, 1, 1], [], []>} : vector<8x256xbf16>, vector<256x256xbf16>, vector<8x256xf32> -> vector<8x256xf32>
    %c0_10 = arith.constant 0 : index
    %c0_11 = arith.constant 0 : index
    %14 = vector.load %arg5[%c0_10, %c0_11] : memref<1x256xf32, #tpu.memory_space<vmem>>, vector<1x256xf32>
    %15 = vector.broadcast %14 : vector<1x256xf32> to vector<8x256xf32>
    %16 = arith.addf %13, %15 : vector<8x256xf32>
    %cst_12 = arith.constant 0.000000e+00 : f32
    %17 = vector.broadcast %cst_12 : f32 to vector<8x256xf32>
    %18 = arith.cmpf ogt, %16, %17 : vector<8x256xf32>
    %cst_13 = arith.constant 0.00999999977 : f32
    %19 = vector.broadcast %cst_13 : f32 to vector<8x256xf32>
    %20 = arith.mulf %19, %16 : vector<8x256xf32>
    %21 = arith.select %18, %16, %20 : vector<8x256xi1>, vector<8x256xf32>
    %22 = arith.truncf %21 : vector<8x256xf32> to vector<8x256xbf16>
    %c0_14 = arith.constant 0 : index
    %c0_15 = arith.constant 0 : index
    %23 = vector.load %arg6[%c0_14, %c0_15] : memref<256x128xbf16, #tpu.memory_space<vmem>>, vector<256x128xbf16>
    %cst_16 = arith.constant dense<0.000000e+00> : vector<8x128xf32>
    %24 = tpu.matmul %22, %23, %cst_16 {dimension_numbers = #tpu.dot_dimension_numbers<[1], [0], [0], [1], [0, 0, 1, 1], [], []>} : vector<8x256xbf16>, vector<256x128xbf16>, vector<8x128xf32> -> vector<8x128xf32>
    %c0_17 = arith.constant 0 : index
    %c0_18 = arith.constant 0 : index
    %25 = vector.load %arg7[%c0_17, %c0_18] : memref<1x128xf32, #tpu.memory_space<vmem>>, vector<1x128xf32>
    %26 = vector.broadcast %25 : vector<1x128xf32> to vector<8x128xf32>
    %27 = arith.addf %24, %26 : vector<8x128xf32>
    %cst_19 = arith.constant 0.000000e+00 : f32
    %28 = vector.broadcast %cst_19 : f32 to vector<8x128xf32>
    %29 = arith.cmpf ogt, %27, %28 : vector<8x128xf32>
    %cst_20 = arith.constant 0.00999999977 : f32
    %30 = vector.broadcast %cst_20 : f32 to vector<8x128xf32>
    %31 = arith.mulf %30, %27 : vector<8x128xf32>
    %32 = arith.select %29, %27, %31 : vector<8x128xi1>, vector<8x128xf32>
    %c0_21 = arith.constant 0 : index
    %c0_22 = arith.constant 0 : index
    %33 = vector.load %arg8[%c0_21, %c0_22] : memref<8x128xf32, #tpu.memory_space<vmem>>, vector<8x128xf32>
    tpu.vector_store %arg8[%c0_21, %c0_22], %32 {strides = array<i32>} : memref<8x128xf32, #tpu.memory_space<vmem>>, vector<8x128xf32>,
    return
  }
  func.func @transform_0(%arg0: i32) -> (i32, i32) {
    %c0_i32 = arith.constant 0 : i32
    %c0_i32_0 = arith.constant 0 : i32
    return %arg0, %c0_i32 : i32, i32
  }
  func.func @transform_1(%arg0: i32) -> (i32, i32) {
    %c0_i32 = arith.constant 0 : i32
    %c0_i32_0 = arith.constant 0 : i32
    %c0_i32_1 = arith.constant 0 : i32
    return %c0_i32, %c0_i32_0 : i32, i32
  }
  func.func @transform_2(%arg0: i32) -> (i32, i32) {
    %c0_i32 = arith.constant 0 : i32
    %c0_i32_0 = arith.constant 0 : i32
    %c0_i32_1 = arith.constant 0 : i32
    return %c0_i32, %c0_i32_0 : i32, i32
  }
  func.func @transform_3(%arg0: i32) -> (i32, i32) {
    %c0_i32 = arith.constant 0 : i32
    %c0_i32_0 = arith.constant 0 : i32
    %c0_i32_1 = arith.constant 0 : i32
    return %c0_i32, %c0_i32_0 : i32, i32
  }
  func.func @transform_4(%arg0: i32) -> (i32, i32) {
    %c0_i32 = arith.constant 0 : i32
    %c0_i32_0 = arith.constant 0 : i32
    %c0_i32_1 = arith.constant 0 : i32
    return %c0_i32, %c0_i32_0 : i32, i32
  }
  func.func @transform_5(%arg0: i32) -> (i32, i32) {
    %c0_i32 = arith.constant 0 : i32
    %c0_i32_0 = arith.constant 0 : i32
    %c0_i32_1 = arith.constant 0 : i32
    return %c0_i32, %c0_i32_0 : i32, i32
  }
  func.func @transform_6(%arg0: i32) -> (i32, i32) {
    %c0_i32 = arith.constant 0 : i32
    %c0_i32_0 = arith.constant 0 : i32
    %c0_i32_1 = arith.constant 0 : i32
    return %c0_i32, %c0_i32_0 : i32, i32
  }
  func.func @transform_7(%arg0: i32) -> (i32, i32) {
    %c0_i32 = arith.constant 0 : i32
    %c0_i32_0 = arith.constant 0 : i32
    return %arg0, %c0_i32 : i32, i32
  }
}

</mosaic_0001>

<bundles_post_ra>
// kernel: q_forward.1
= control target key start
LH: loop header
LB: loop body
LE: loop exit
PB: predicated region body
PF: predicated region fallthrough
CT: control target
= control target key end

     0   :  { %v833_v2 = vmov 0   ;;  %s1091_s0 = inlined_call_operand.vmem [shape: bf16[8,128], index: 0, kind: input, shape index: {}]   ;;  %s1092_s1 = inlined_call_operand.vmem [shape: bf16[128,256], index: 1, kind: input, shape index: {}]   ;;  %s1093_s2 = inlined_call_operand.vmem [shape: f32[1,256], index: 2, kind: input, shape index: {}]   ;;  %s1094_s3 = inlined_call_operand.vmem [shape: bf16[256,256], index: 3, kind: input, shape index: {}]   ;;  %s1095_s4 = inlined_call_operand.vmem [shape: f32[1,256], index: 4, kind: input, shape index: {}]   ;;  %s1096_s5 = inlined_call_operand.vmem [shape: bf16[256,128], index: 5, kind: input, shape index: {}]   ;;  %s1097_s6 = inlined_call_operand.vmem [shape: f32[1,128], index: 6, kind: input, shape index: {}]   ;;  %s1098_s7 = inlined_call_operand.hbm [shape: f32[8,128], index: 7, kind: output, shape index: {}]  }
   0x1   :  { %v721_v0 = vld [vmem:[%s1092_s1 + $0x4] ss:$8 sps:$4 sm:$0xff]   ;;  %v723_v1 = vld [vmem:[%s1092_s1] ss:$8 sps:$4 sm:$0xff]   ;;  %169 = vmatprep.mubr.bf16.mxu0 %v833_v2  ;;  %v724_v3 = vld [vmem:[%s1092_s1 + $0x14] ss:$8 sps:$4 sm:$0xff]  }
   0x2   :  { %137 = vmatprep.subr.bf16.mxu0 %v721_v0  ;;  %v726_v4 = vld [vmem:[%s1092_s1 + $0x10] ss:$8 sps:$4 sm:$0xff]   ;;  %v727_v5 = vld [vmem:[%s1092_s1 + $0x24] ss:$8 sps:$4 sm:$0xff]   ;;  %v729_v6 = vld [vmem:[%s1092_s1 + $0x20] ss:$8 sps:$4 sm:$0xff]  }
   0x3   :  { %138 = vmatpush1.bf16.msra.mxu0 %v723_v1  ;;  %v730_v7 = vld [vmem:[%s1092_s1 + $0x34] ss:$8 sps:$4 sm:$0xff]   ;;  %v732_v8 = vld [vmem:[%s1092_s1 + $0x30] ss:$8 sps:$4 sm:$0xff]   ;;  %v733_v9 = vld [vmem:[%s1092_s1 + $0x44] ss:$8 sps:$4 sm:$0xff]  }
   0x4   :  { %139 = vmatprep.subr.bf16.mxu0 %v724_v3  ;;  %v745_v10 = vld [vmem:[%s1094_s3 + $0x4] ss:$8 sps:$4 sm:$0xff]   ;;  %v747_v11 = vld [vmem:[%s1094_s3] ss:$8 sps:$4 sm:$0xff]   ;;  %v748_v12 = vld [vmem:[%s1094_s3 + $0x14] ss:$8 sps:$4 sm:$0xff]  }
   0x5   :  { %390 = vmatprep.subr.bf16.mxu1 %v745_v10  ;;  %v735_v13 = vld [vmem:[%s1092_s1 + $0x40] ss:$8 sps:$4 sm:$0xff]   ;;  %v750_v14 = vld [vmem:[%s1094_s3 + $0x10] ss:$8 sps:$4 sm:$0xff]   ;;  %v751_v15 = vld [vmem:[%s1094_s3 + $0x24] ss:$8 sps:$4 sm:$0xff]  }
   0x6   :  { %391 = vmatpush1.bf16.msra.mxu1 %v747_v11  ;;  %v736_v16 = vld [vmem:[%s1092_s1 + $0x54] ss:$8 sps:$4 sm:$0xff]   ;;  %v738_v17 = vld [vmem:[%s1092_s1 + $0x50] ss:$8 sps:$4 sm:$0xff]   ;;  %v753_v18 = vld [vmem:[%s1094_s3 + $0x20] ss:$8 sps:$4 sm:$0xff]  }
   0x7   :  { %140 = vmatpush1.bf16.msra.mxu0 %v726_v4  ;;  %392 = vmatprep.subr.bf16.mxu1 %v748_v12  ;;  %v754_v19 = vld [vmem:[%s1094_s3 + $0x34] ss:$8 sps:$4 sm:$0xff]   ;;  %v739_v20 = vld [vmem:[%s1092_s1 + $0x64] ss:$8 sps:$4 sm:$0xff]   ;;  %v741_v21 = vld [vmem:[%s1092_s1 + $0x60] ss:$8 sps:$4 sm:$0xff]  }
   0x8   :  { %141 = vmatprep.subr.bf16.mxu0 %v727_v5  ;;  %v756_v22 = vld [vmem:[%s1094_s3 + $0x30] ss:$8 sps:$4 sm:$0xff]   ;;  %v757_v23 = vld [vmem:[%s1094_s3 + $0x44] ss:$8 sps:$4 sm:$0xff]   ;;  %v742_v24 = vld [vmem:[%s1092_s1 + $0x74] ss:$8 sps:$4 sm:$0xff]  }
   0x9   :  { %v744_v25 = vld [vmem:[%s1092_s1 + $0x70] ss:$8 sps:$4 sm:$0xff]   ;;  %v759_v26 = vld [vmem:[%s1094_s3 + $0x40] ss:$8 sps:$4 sm:$0xff]   ;;  %v760_v27 = vld [vmem:[%s1094_s3 + $0x54] ss:$8 sps:$4 sm:$0xff]  }
   0xa   :  { %393 = vmatpush1.bf16.msra.mxu1 %v750_v14  ;;  %v28_v28 = vld [vmem:[%s1091_s0] sm:$0xf]  ;;  %v762_v29 = vld [vmem:[%s1094_s3 + $0x50] ss:$8 sps:$4 sm:$0xff]   ;;  %v763_v30 = vld [vmem:[%s1094_s3 + $0x64] ss:$8 sps:$4 sm:$0xff]  }
   0xb   :  { %142 = vmatpush1.bf16.msra.mxu0 %v729_v6  ;;  %394 = vmatprep.subr.bf16.mxu1 %v751_v15  ;;  %v765_v31 = vld [vmem:[%s1094_s3 + $0x60] ss:$8 sps:$4 sm:$0xff]   ;;  %v766_v32 = vld [vmem:[%s1094_s3 + $0x74] ss:$8 sps:$4 sm:$0xff]   ;;  %v768_v33 = vld [vmem:[%s1094_s3 + $0x70] ss:$8 sps:$4 sm:$0xff]  }
   0xc   :  { %143 = vmatprep.subr.bf16.mxu0 %v730_v7  ;;  %v769_v34 = vld [vmem:[%s1094_s3 + $0x84] ss:$8 sps:$4 sm:$0xff]   ;;  %v771_v35 = vld [vmem:[%s1094_s3 + $0x80] ss:$8 sps:$4 sm:$0xff]  }
   0xe   :  { %395 = vmatpush1.bf16.msra.mxu1 %v753_v18 }
   0xf   :  { %144 = vmatpush1.bf16.msra.mxu0 %v732_v8  ;;  %396 = vmatprep.subr.bf16.mxu1 %v754_v19 }
  0x10   :  { %145 = vmatprep.subr.bf16.mxu0 %v733_v9 }
  0x12   :  { %397 = vmatpush1.bf16.msra.mxu1 %v756_v22 }
  0x13   :  { %146 = vmatpush1.bf16.msra.mxu0 %v735_v13  ;;  %398 = vmatprep.subr.bf16.mxu1 %v757_v23 }
  0x14   :  { %147 = vmatprep.subr.bf16.mxu0 %v736_v16 }
  0x16   :  { %399 = vmatpush1.bf16.msra.mxu1 %v759_v26 }
  0x17   :  { %148 = vmatpush1.bf16.msra.mxu0 %v738_v17  ;;  %400 = vmatprep.subr.bf16.mxu1 %v760_v27 }
  0x18   :  { %149 = vmatprep.subr.bf16.mxu0 %v739_v20 }
  0x1a   :  { %401 = vmatpush1.bf16.msra.mxu1 %v762_v29 }
  0x1b   :  { %150 = vmatpush1.bf16.msra.mxu0 %v741_v21  ;;  %402 = vmatprep.subr.bf16.mxu1 %v763_v30 }
  0x1c   :  { %151 = vmatprep.subr.bf16.mxu0 %v742_v24 }
  0x1e   :  { %403 = vmatpush1.bf16.msra.mxu1 %v765_v31 }
  0x1f   :  { %152 = vmatpush1.bf16.msra.mxu0 %v744_v25  ;;  %404 = vmatprep.subr.bf16.mxu1 %v766_v32 }
  0x22   :  { %170 = vmatmul.mubr.bf16.vlgmr.msra.gmra.mrb[0].mxu0 %v28_v28  ;;  %405 = vmatpush1.bf16.msra.mxu1 %v768_v33 }
  0x23   :  { %12 = vsyncpa [#allocation3], 0  ;;  %406 = vmatprep.subr.bf16.mxu1 %v769_v34  ;;  %v772_v36 = vld [vmem:[%s1094_s3 + $0x94] ss:$8 sps:$4 sm:$0xff]   ;;  %v774_v37 = vld [vmem:[%s1094_s3 + $0x90] ss:$8 sps:$4 sm:$0xff]   ;;  %v47_v62 = vlaneseq }
  0x24   :  { %v775_v38 = vld [vmem:[%s1094_s3 + $0xa4] ss:$8 sps:$4 sm:$0xff]   ;;  %v777_v39 = vld [vmem:[%s1094_s3 + $0xa0] ss:$8 sps:$4 sm:$0xff]   ;;  %v778_v40 = vld [vmem:[%s1094_s3 + $0xb4] ss:$8 sps:$4 sm:$0xff]  }
  0x25   :  { %v780_v41 = vld [vmem:[%s1094_s3 + $0xb0] ss:$8 sps:$4 sm:$0xff]   ;;  %v781_v42 = vld [vmem:[%s1094_s3 + $0xc4] ss:$8 sps:$4 sm:$0xff]   ;;  %v783_v43 = vld [vmem:[%s1094_s3 + $0xc0] ss:$8 sps:$4 sm:$0xff]  }
  0x26   :  { %407 = vmatpush1.bf16.msra.mxu1 %v771_v35  ;;  %v784_v44 = vld [vmem:[%s1094_s3 + $0xd4] ss:$8 sps:$4 sm:$0xff]   ;;  %v786_v45 = vld [vmem:[%s1094_s3 + $0xd0] ss:$8 sps:$4 sm:$0xff]   ;;  %v787_v46 = vld [vmem:[%s1094_s3 + $0xe4] ss:$8 sps:$4 sm:$0xff]  }
  0x27   :  { %408 = vmatprep.subr.bf16.mxu1 %v772_v36  ;;  %v789_v47 = vld [vmem:[%s1094_s3 + $0xe0] ss:$8 sps:$4 sm:$0xff]   ;;  %v790_v48 = vld [vmem:[%s1094_s3 + $0xf4] ss:$8 sps:$4 sm:$0xff]   ;;  %v792_v49 = vld [vmem:[%s1094_s3 + $0xf0] ss:$8 sps:$4 sm:$0xff]  }
  0x28   :  { %v793_v50 = vld [vmem:[%s1096_s5 + $0x40] sm:$0xff]   ;;  %v795_v52 = vld [vmem:[%s1096_s5 + $0x48] sm:$0xff]   ;;  %v797_v54 = vld [vmem:[%s1096_s5 + $0x50] sm:$0xff]   ;;  %v48_v63 = vshrl.u32 %v47_v62, 7  ;;  %s834_s11 = smov [#allocation2]  }
  0x29   :  { %v794_v51 = vld [vmem:[%s1096_s5] sm:$0xff]   ;;  %697 = vmatprep.subr.bf16.mxu0 %v793_v50  ;;  %v796_v53 = vld [vmem:[%s1096_s5 + $0x8] sm:$0xff]   ;;  %v798_v55 = vld [vmem:[%s1096_s5 + $0x10] sm:$0xff]   ;;  %s624_s12 = sshll.u32 %s834_s11, 4  ;;  %s625_s12 = int_to_ptr.vmem [resolvable:$true] %s624_s12 }
  0x2a   :  { %409 = vmatpush1.bf16.msra.mxu1 %v774_v37  ;;  %698 = vmatpush3.bf16.msra.mxu0 %v794_v51  ;;  %v799_v56 = vld [vmem:[%s1096_s5 + $0x58] sm:$0xff]   ;;  %v801_v58 = vld [vmem:[%s1096_s5 + $0x60] sm:$0xff]   ;;  %v803_v60 = vld [vmem:[%s1096_s5 + $0x68] sm:$0xff]   ;;  %v49_v0 = vsub.s32 0, %v48_v63  ;;  %v53_v2 = vsub.s32 1, %v48_v63  ;;  %s809_s1 = scalar_lea.vmem %s625_s12, 128  ;;  %p814_p1 = scmp.lt.s32.totalorder %s625_s12, %s625_s12 }
  0x2b   :  { %410 = vmatprep.subr.bf16.mxu1 %v775_v38  ;;  %699 = vmatprep.subr.bf16.mxu0 %v795_v52  ;;  %v800_v57 = vld [vmem:[%s1096_s5 + $0x18] sm:$0xff]   ;;  %v802_v59 = vld [vmem:[%s1096_s5 + $0x20] sm:$0xff]   ;;  %v804_v61 = vld [vmem:[%s1096_s5 + $0x28] sm:$0xff]   ;;  %p810_p0 = scmp.ne.s32.totalorder %s625_s12, %s809_s1  ;;  %p815_p2 = scmp.lt.s32.totalorder %s809_s1, %s809_s1 }
  0x2c   :  { %v45_v1 = vld [vmem:[%s1093_s2] sm:$0x3]  ;;  %v805_v17 = vld [vmem:[%s1096_s5 + $0x70] sm:$0xff]   ;;  %v807_v19 = vld [vmem:[%s1096_s5 + $0x78] sm:$0xff]  }
  0x2d   :  { %v50_v3 = vrot.slane %v45_v1, %v49_v0  ;;  %v54_v4 = vrot.slane %v45_v1, %v53_v2  ;;  %v806_v18 = vld [vmem:[%s1096_s5 + $0x30] sm:$0xff]   ;;  %v808_v20 = vld [vmem:[%s1096_s5 + $0x38] sm:$0xff]   ;;  %v218_v21 = vld [vmem:[%s1095_s4] sm:$0x3]  ;;  %p816_p3 = por %p815_p2, %p814_p1 }
  0x2e   :  { %411 = vmatpush1.bf16.msra.mxu1 %v777_v39  ;;  %700 = vmatpush3.bf16.msra.mxu0 %v796_v53  ;;  %v223_v22 = vrot.slane %v218_v21, %v49_v0  ;;  %v227_v23 = vrot.slane %v218_v21, %v53_v2  ;;  %v680_v37 = vld [vmem:[%s1097_s6] ss:$0 sm:$0xff] }
  0x2f   :  { %412 = vmatprep.subr.bf16.mxu1 %v778_v40  ;;  %701 = vmatprep.subr.bf16.mxu0 %v797_v54  ;;  %p817_p4 = pnand %p816_p3, %p810_p0 }
  0x32   :  { %413 = vmatpush1.bf16.msra.mxu1 %v780_v41  ;;  %702 = vmatpush3.bf16.msra.mxu0 %v798_v55 }
  0x33   :  { %414 = vmatprep.subr.bf16.mxu1 %v781_v42  ;;  %703 = vmatprep.subr.bf16.mxu0 %v799_v56 }
  0x36   :  { %415 = vmatpush1.bf16.msra.mxu1 %v783_v43  ;;  %704 = vmatpush3.bf16.msra.mxu0 %v800_v57 }
  0x37   :  { %416 = vmatprep.subr.bf16.mxu1 %v784_v44  ;;  %705 = vmatprep.subr.bf16.mxu0 %v801_v58 }
  0x3a   :  { %417 = vmatpush1.bf16.msra.mxu1 %v786_v45  ;;  %706 = vmatpush3.bf16.msra.mxu0 %v802_v59 }
  0x3b   :  { %418 = vmatprep.subr.bf16.mxu1 %v787_v46  ;;  %707 = vmatprep.subr.bf16.mxu0 %v803_v60 }
  0x3e   :  { %419 = vmatpush1.bf16.msra.mxu1 %v789_v47  ;;  %708 = vmatpush3.bf16.msra.mxu0 %v804_v61 }
  0x3f   :  { %420 = vmatprep.subr.bf16.mxu1 %v790_v48  ;;  %709 = vmatprep.subr.bf16.mxu0 %v805_v17 }
  0x42   :  { %421 = vmatpush1.bf16.msra.mxu1 %v792_v49  ;;  %710 = vmatpush3.bf16.msra.mxu0 %v806_v18 }
  0x43   :  { %711 = vmatprep.subr.bf16.mxu0 %v807_v19 }
  0x46   :  { %712 = vmatpush3.bf16.msra.mxu0 %v808_v20 }
  0xf5   :  { %v171_v5 = vpop.f32.mrb[0].mxu0 }
  0xf6   :  { %v172_v6 = vadd.f32 %v171_v5, %v50_v3  ;;  %v173_v7 = vpop.f32.mrb[1].mxu0 }
  0xf7   :  { %v174_v8 = vadd.f32 %v173_v7, %v54_v4  ;;  %v175_v9 = vpop.f32.mrb[2].mxu0 }
  0xf8   :  { %vm178_vm0 = vcmp.gt.f32.partialorder %v172_v6, 0.0  ;;  %v180_v10 = vmul.f32 0.01, %v172_v6  ;;  %v176_v11 = vpop.f32.mrb[3].mxu0 }
  0xf9   :  { %vm179_vm1 = vcmp.gt.f32.partialorder %v174_v8, 0.0  ;;  %v181_v12 = vmul.f32 0.01, %v174_v8 }
  0xfa   :  { %v182_v13 = vsel %vm178_vm0, %v172_v6, %v180_v10 }
  0xfb   :  { %v183_v14 = vsel %vm179_vm1, %v174_v8, %v181_v12  ;;  %v184_v16 = vpack.c.bf16 %v182_v13, %v182_v13 }
  0xfc   :  { %v185_v15 = vpack.c.bf16 %v183_v14, %v183_v14 }
  0xfe   :  { %422 = vmatprep.mubr.bf16.mxu1 %v185_v15 }
  0xff   :  { %423 = vmatmul.mubr.bf16.vlgmr.msra.gmra.mrb[0].mxu1 %v184_v16 }
 0x1d2   :  { %v424_v24 = vpop.f32.mrb[0].mxu1 }
 0x1d3   :  { %v425_v25 = vadd.f32 %v424_v24, %v223_v22  ;;  %v426_v26 = vpop.f32.mrb[1].mxu1 }
 0x1d4   :  { %v427_v27 = vadd.f32 %v426_v26, %v227_v23  ;;  %v428_v28 = vpop.f32.mrb[2].mxu1 }
 0x1d5   :  { %vm431_vm2 = vcmp.gt.f32.partialorder %v425_v25, 0.0  ;;  %v433_v29 = vmul.f32 0.01, %v425_v25  ;;  %v429_v30 = vpop.f32.mrb[3].mxu1 }
 0x1d6   :  { %vm432_vm3 = vcmp.gt.f32.partialorder %v427_v27, 0.0  ;;  %v434_v31 = vmul.f32 0.01, %v427_v27 }
 0x1d7   :  { %v435_v32 = vsel %vm431_vm2, %v425_v25, %v433_v29 }
 0x1d8   :  { %v436_v33 = vsel %vm432_vm3, %v427_v27, %v434_v31  ;;  %v437_v35 = vpack.c.bf16 %v435_v32, %v435_v32 }
 0x1d9   :  { %v438_v34 = vpack.c.bf16 %v436_v33, %v436_v33 }
 0x1db   :  { %606 = vmatprep.mubr.bf16.mxu0 %v438_v34 }
 0x1dc   :  { %607 = vmatmul.mubr.bf16.vlgmr.msra.gmra.mrb[4].mxu0 %v437_v35 }
 0x2af   :  { %v713_v36 = vpop.f32.mrb[4].mxu0 }
 0x2b0   :  { %v714_v38 = vpop.f32.mrb[5].mxu0 }
 0x2b1   :  { %v715_v39 = vadd.f32 %v714_v38, %v713_v36  ;;  %v716_v40 = vpop.f32.mrb[6].mxu0 }
 0x2b2   :  { %v717_v41 = vpop.f32.mrb[7].mxu0 }
 0x2b3   :  { %v609_v42 = vadd.f32 %v715_v39, %v680_v37 }
 0x2b5   :  { %vm614_vm4 = vcmp.gt.f32.partialorder %v609_v42, 0.0  ;;  %v615_v43 = vmul.f32 0.01, %v609_v42 }
 0x2b7   :  { %v616_v44 = vsel %vm614_vm4, %v609_v42, %v615_v43 }
 0x2b8   :  { %617 = vst [vmem:[#allocation2] sm:$0xff] %v616_v44 }
 0x2b9   :  { %820 = shalt.err (!%p817_p4)
}
 0x2ba   :  { %s821_s14 = scalar_lea.hbm %s1098_s7, 128 }
 0x2bb   :  { %p822_p5 = scmp.ne.s32.totalorder %s1098_s7, %s821_s14  ;;  %p825_p6 = scmp.lt.u32.totalorder %s821_s14, %s1098_s7 }
 0x2bd   :  { %p827_p7 = pnand %p825_p6, %p822_p5 }
 0x2bf   :  { %830 = shalt.err (!%p827_p7)
}
 0x2c0   :  { %627 = dma.vmem_to_hbm [thread:$0]  %s625_s12, 128, %s1098_s7, [#allocation3]  }
 0x2c1   :  { %831 = dma.done.wait [#allocation3], 128  }
 0x2c2   :  { %832 = vsyncadd [#allocation3], 4294967168 }
 0x2c3   :  { %631 = vsyncpa [#allocation3], 1 }

</bundles_post_ra>
